<compile_context>
chip_gen: v6e
topology: v6e:2x2x1
jax: 0.10.0
libtpu: 0.0.40
codegen_flags: <defaults>
</compile_context>

<pallas_src>
import functools

import jax
import jax.numpy as jnp
from jax import lax
from jax.experimental import pallas as pl
from jax.experimental.pallas import tpu as pltpu


def _telu(x, alpha, exp_dtype=jnp.float32):
    # TeLU as defined in the module: x if x >= 0 else alpha * (exp(x) - 1).
    # exp(min(x, 0)) keeps the transcendental argument bounded (also makes any
    # unspecified tail-block values harmless) and is exact on the selected branch.
    neg = jnp.minimum(x, 0.0)
    e = jnp.exp(neg.astype(exp_dtype)).astype(jnp.float32)
    return jnp.where(x >= 0, x, alpha * (e - 1.0))


def ffnn_kernel(x_ref, w1_ref, b1_ref, w2_ref, b2_ref, w3_ref, b3_ref, o_ref,
                *, exp_dtype):
    x = x_ref[...]                                                  # (TB, d_in)

    # (32, d_in) x (TB, d_in) contracting dim 1 of both -> (32, TB).
    h1 = lax.dot_general(w1_ref[...], x,
                         dimension_numbers=(((1,), (1,)), ((), ())),
                         preferred_element_type=jnp.float32) + b1_ref[...]
    h1 = _telu(h1, 0.15, exp_dtype)                                 # (32, TB)

    h2 = jnp.dot(w2_ref[...], h1,
                 preferred_element_type=jnp.float32) + b2_ref[...]
    h2 = _telu(h2, 0.10, exp_dtype)                                 # (64, TB)

    out = jnp.dot(w3_ref[...], h2,
                  preferred_element_type=jnp.float32) + b3_ref[...]
    o_ref[...] = out.astype(o_ref.dtype)                            # (4, TB) lane-dense


def _round_up(n, m):
    return ((n + m - 1) // m) * m


@functools.partial(jax.jit, static_argnames=("tb", "bf16_exp"))
def ffnn_forward(x, params, *, tb=8192, bf16_exp=False):
    """x: (B, input_size) f32 -> (B, 4) f32.

    params (PyTorch nn.Linear layout):
      w1 (32, d_in), b1 (32, 1), w2 (64, 32), b2 (64, 1), w3 (4, 64), b3 (4, 1)
    """
    B, d_in = x.shape
    w1, b1 = params["w1"], params["b1"]
    w2, b2 = params["w2"], params["b2"]
    w3, b3 = params["w3"], params["b3"]
    n1, n2, d_out = w1.shape[0], w2.shape[0], w3.shape[0]

    # Lane-aligned batch tile: as large as requested, but capped at ~half the
    # (128-rounded) batch so the grid has >=2 steps whenever B allows it.
    tb_r = _round_up(max(tb, 128), 128)
    half = _round_up(pl.cdiv(_round_up(B, 128), 2), 128)
    tile = max(128, min(tb_r, half))
    nblk = pl.cdiv(B, tile)
    Bp = nblk * tile

    grid = (nblk,)
    in_specs = [
        pl.BlockSpec((tile, d_in), lambda i: (i, 0)),   # x: natural layout, no pad
        pl.BlockSpec((n1, d_in), lambda i: (0, 0)),     # weights/biases: VMEM-resident
        pl.BlockSpec((n1, 1), lambda i: (0, 0)),
        pl.BlockSpec((n2, n1), lambda i: (0, 0)),
        pl.BlockSpec((n2, 1), lambda i: (0, 0)),
        pl.BlockSpec((d_out, n2), lambda i: (0, 0)),
        pl.BlockSpec((d_out, 1), lambda i: (0, 0)),
    ]
    out_specs = pl.BlockSpec((d_out, tile), lambda i: (0, i))  # lane-dense store

    flops = 2 * Bp * (d_in * n1 + n1 * n2 + n2 * d_out)
    bytes_accessed = 4 * (B * d_in + Bp * d_out
                          + n1 * d_in + n2 * n1 + d_out * n2 + n1 + n2 + d_out)
    cost = pl.CostEstimate(flops=flops,
                           transcendentals=Bp * (n1 + n2),
                           bytes_accessed=bytes_accessed)

    kern = functools.partial(
        ffnn_kernel, exp_dtype=jnp.bfloat16 if bf16_exp else jnp.float32)

    outT = pl.pallas_call(
        kern,
        out_shape=jax.ShapeDtypeStruct((d_out, Bp), jnp.float32),
        grid=grid,
        in_specs=in_specs,
        out_specs=out_specs,
        compiler_params=pltpu.CompilerParams(
            dimension_semantics=("parallel",),        # megacore-shard batch (v7x)
            vmem_limit_bytes=40 * 1024 * 1024,        # covers lane-padded x blocks on v5e
        ),
        cost_estimate=cost,
    )(x, w1, b1, w2, b2, w3, b3)

    # Tiny (4, Bp) -> (B, 4) relayout (~32 B/sample); valid columns only.
    return outT[:, :B].T


def xavier_uniform(key, fan_out, fan_in, dtype=jnp.float32):
    # torch.nn.init.xavier_uniform_ (gain=1.0) on a (out, in) weight.
    bound = (6.0 / (fan_in + fan_out)) ** 0.5
    return jax.random.uniform(key, (fan_out, fan_in), dtype, -bound, bound)


def init_params(key, input_size):
    k1, k2, k3 = jax.random.split(key, 3)
    return {
        "w1": xavier_uniform(k1, 32, input_size),
        "b1": jnp.zeros((32, 1), jnp.float32),
        "w2": xavier_uniform(k2, 64, 32),
        "b2": jnp.zeros((64, 1), jnp.float32),
        "w3": xavier_uniform(k3, 4, 64),
        "b3": jnp.zeros((4, 1), jnp.float32),
    }


def ffnn_reference(x, p):
    h1 = _telu(x @ p["w1"].T + p["b1"].T, 0.15)
    h2 = _telu(h1 @ p["w2"].T + p["b2"].T, 0.10)
    return h2 @ p["w3"].T + p["b3"].T


if __name__ == "__main__":
    key = jax.random.PRNGKey(0)
    kx, kp, kx2 = jax.random.split(key, 3)

    # Small shapes consistent with the module: batch=8, input_size=16.
    B, input_size = 8, 16
    params = init_params(kp, input_size)

    x = jax.random.normal(kx, (B, input_size), jnp.float32)
    out = jax.block_until_ready(ffnn_forward(x, params))
    ref = ffnn_reference(x, params)
    assert out.shape == (B, 4), out.shape
    assert jnp.allclose(out, ref, atol=2e-5, rtol=1e-5), (
        float(jnp.max(jnp.abs(out - ref))))

    # Ragged batch + multi-step grid (tile=256 -> 2 grid steps, last block reads
    # past the end of x).
    B2 = 300
    x2 = jax.random.normal(kx2, (B2, input_size), jnp.float32)
    out2 = jax.block_until_ready(ffnn_forward(x2, params, tb=256))
    ref2 = ffnn_reference(x2, params)
    assert out2.shape == (B2, 4), out2.shape
    assert jnp.allclose(out2, ref2, atol=2e-5, rtol=1e-5), (
        float(jnp.max(jnp.abs(out2 - ref2))))

    # Optional EUP optimization (intended for v6e/v7x): bf16 exp on the negative
    # branch; looser tolerance on purpose.
    out3 = jax.block_until_ready(ffnn_forward(x2, params, tb=256, bf16_exp=True))
    assert jnp.allclose(out3, ref2, atol=5e-2, rtol=5e-2), (
        float(jnp.max(jnp.abs(out3 - ref2))))

    print("KERNEL_OK")
</pallas_src>

<mosaic_0001>
module attributes {stable_mosaic.version = 11 : i64} {
  func.func @ffnn_kernel(%arg0: i32, %arg1: memref<128x16xf32, #tpu.memory_space<vmem>>, %arg2: memref<32x16xf32, #tpu.memory_space<vmem>>, %arg3: memref<32x1xf32, #tpu.memory_space<vmem>>, %arg4: memref<64x32xf32, #tpu.memory_space<vmem>>, %arg5: memref<64x1xf32, #tpu.memory_space<vmem>>, %arg6: memref<4x64xf32, #tpu.memory_space<vmem>>, %arg7: memref<4x1xf32, #tpu.memory_space<vmem>>, %arg8: memref<4x128xf32, #tpu.memory_space<vmem>>) attributes {dimension_semantics = [#tpu.dimension_semantics<parallel>], iteration_bounds = array<i64: 1>, scalar_prefetch = 0 : i64, scratch_operands = 0 : i64, tpu.core_type = #tpu.core_type<tc>, window_params = [{transform_indices = @transform_0, window_bounds = array<i64: 128, 16>}, {pipeline_mode = #tpu.pipeline_mode<synchronous>, transform_indices = @transform_1, window_bounds = array<i64: 32, 16>}, {pipeline_mode = #tpu.pipeline_mode<synchronous>, transform_indices = @transform_2, window_bounds = array<i64: 32, 1>}, {pipeline_mode = #tpu.pipeline_mode<synchronous>, transform_indices = @transform_3, window_bounds = array<i64: 64, 32>}, {pipeline_mode = #tpu.pipeline_mode<synchronous>, transform_indices = @transform_4, window_bounds = array<i64: 64, 1>}, {pipeline_mode = #tpu.pipeline_mode<synchronous>, transform_indices = @transform_5, window_bounds = array<i64: 4, 64>}, {pipeline_mode = #tpu.pipeline_mode<synchronous>, transform_indices = @transform_6, window_bounds = array<i64: 4, 1>}, {transform_indices = @transform_7, window_bounds = array<i64: 4, 128>}]} {
    %c0 = arith.constant 0 : index
    %c0_0 = arith.constant 0 : index
    %0 = vector.load %arg1[%c0, %c0_0] : memref<128x16xf32, #tpu.memory_space<vmem>>, vector<128x16xf32>
    %c0_1 = arith.constant 0 : index
    %c0_2 = arith.constant 0 : index
    %1 = vector.load %arg2[%c0_1, %c0_2] : memref<32x16xf32, #tpu.memory_space<vmem>>, vector<32x16xf32>
    %cst = arith.constant dense<0.000000e+00> : vector<32x128xf32>
    %2 = tpu.matmul %1, %0, %cst {dimension_numbers = #tpu.dot_dimension_numbers<[1], [1], [0], [0], [0, 0, 1, 0], [], []>} : vector<32x16xf32>, vector<128x16xf32>, vector<32x128xf32> -> vector<32x128xf32>
    %c0_3 = arith.constant 0 : index
    %c0_4 = arith.constant 0 : index
    %3 = vector.load %arg3[%c0_3, %c0_4] : memref<32x1xf32, #tpu.memory_space<vmem>>, vector<32x1xf32>
    %4 = vector.broadcast %3 : vector<32x1xf32> to vector<32x128xf32>
    %5 = arith.addf %2, %4 : vector<32x128xf32>
    %cst_5 = arith.constant 0.000000e+00 : f32
    %6 = vector.broadcast %cst_5 : f32 to vector<32x128xf32>
    %7 = arith.minimumf %5, %6 : vector<32x128xf32>
    %8 = math.exp %7 : vector<32x128xf32>
    %cst_6 = arith.constant 0.000000e+00 : f32
    %9 = vector.broadcast %cst_6 : f32 to vector<32x128xf32>
    %10 = arith.cmpf oge, %5, %9 : vector<32x128xf32>
    %cst_7 = arith.constant 1.000000e+00 : f32
    %11 = vector.broadcast %cst_7 : f32 to vector<32x128xf32>
    %12 = arith.subf %8, %11 : vector<32x128xf32>
    %cst_8 = arith.constant 1.500000e-01 : f32
    %13 = vector.broadcast %cst_8 : f32 to vector<32x128xf32>
    %14 = arith.mulf %13, %12 : vector<32x128xf32>
    %15 = arith.select %10, %5, %14 : vector<32x128xi1>, vector<32x128xf32>
    %c0_9 = arith.constant 0 : index
    %c0_10 = arith.constant 0 : index
    %16 = vector.load %arg4[%c0_9, %c0_10] : memref<64x32xf32, #tpu.memory_space<vmem>>, vector<64x32xf32>
    %cst_11 = arith.constant dense<0.000000e+00> : vector<64x128xf32>
    %17 = tpu.matmul %16, %15, %cst_11 {dimension_numbers = #tpu.dot_dimension_numbers<[1], [0], [0], [1], [0, 0, 1, 1], [], []>} : vector<64x32xf32>, vector<32x128xf32>, vector<64x128xf32> -> vector<64x128xf32>
    %c0_12 = arith.constant 0 : index
    %c0_13 = arith.constant 0 : index
    %18 = vector.load %arg5[%c0_12, %c0_13] : memref<64x1xf32, #tpu.memory_space<vmem>>, vector<64x1xf32>
    %19 = vector.broadcast %18 : vector<64x1xf32> to vector<64x128xf32>
    %20 = arith.addf %17, %19 : vector<64x128xf32>
    %cst_14 = arith.constant 0.000000e+00 : f32
    %21 = vector.broadcast %cst_14 : f32 to vector<64x128xf32>
    %22 = arith.minimumf %20, %21 : vector<64x128xf32>
    %23 = math.exp %22 : vector<64x128xf32>
    %cst_15 = arith.constant 0.000000e+00 : f32
    %24 = vector.broadcast %cst_15 : f32 to vector<64x128xf32>
    %25 = arith.cmpf oge, %20, %24 : vector<64x128xf32>
    %cst_16 = arith.constant 1.000000e+00 : f32
    %26 = vector.broadcast %cst_16 : f32 to vector<64x128xf32>
    %27 = arith.subf %23, %26 : vector<64x128xf32>
    %cst_17 = arith.constant 1.000000e-01 : f32
    %28 = vector.broadcast %cst_17 : f32 to vector<64x128xf32>
    %29 = arith.mulf %28, %27 : vector<64x128xf32>
    %30 = arith.select %25, %20, %29 : vector<64x128xi1>, vector<64x128xf32>
    %c0_18 = arith.constant 0 : index
    %c0_19 = arith.constant 0 : index
    %31 = vector.load %arg6[%c0_18, %c0_19] : memref<4x64xf32, #tpu.memory_space<vmem>>, vector<4x64xf32>
    %cst_20 = arith.constant dense<0.000000e+00> : vector<4x128xf32>
    %32 = tpu.matmul %31, %30, %cst_20 {dimension_numbers = #tpu.dot_dimension_numbers<[1], [0], [0], [1], [0, 0, 1, 1], [], []>} : vector<4x64xf32>, vector<64x128xf32>, vector<4x128xf32> -> vector<4x128xf32>
    %c0_21 = arith.constant 0 : index
    %c0_22 = arith.constant 0 : index
    %33 = vector.load %arg7[%c0_21, %c0_22] : memref<4x1xf32, #tpu.memory_space<vmem>>, vector<4x1xf32>
    %34 = vector.broadcast %33 : vector<4x1xf32> to vector<4x128xf32>
    %35 = arith.addf %32, %34 : vector<4x128xf32>
    %c0_23 = arith.constant 0 : index
    %c0_24 = arith.constant 0 : index
    %36 = vector.load %arg8[%c0_23, %c0_24] : memref<4x128xf32, #tpu.memory_space<vmem>>, vector<4x128xf32>
    tpu.vector_store %arg8[%c0_23, %c0_24], %35 {strides = array<i32>} : memref<4x128xf32, #tpu.memory_space<vmem>>, vector<4x128xf32>,
    return
  }
  func.func @transform_0(%arg0: i32) -> (i32, i32) {
    %c0_i32 = arith.constant 0 : i32
    %c0_i32_0 = arith.constant 0 : i32
    return %arg0, %c0_i32 : i32, i32
  }
  func.func @transform_1(%arg0: i32) -> (i32, i32) {
    %c0_i32 = arith.constant 0 : i32
    %c0_i32_0 = arith.constant 0 : i32
    %c0_i32_1 = arith.constant 0 : i32
    return %c0_i32, %c0_i32_0 : i32, i32
  }
  func.func @transform_2(%arg0: i32) -> (i32, i32) {
    %c0_i32 = arith.constant 0 : i32
    %c0_i32_0 = arith.constant 0 : i32
    %c0_i32_1 = arith.constant 0 : i32
    return %c0_i32, %c0_i32_0 : i32, i32
  }
  func.func @transform_3(%arg0: i32) -> (i32, i32) {
    %c0_i32 = arith.constant 0 : i32
    %c0_i32_0 = arith.constant 0 : i32
    %c0_i32_1 = arith.constant 0 : i32
    return %c0_i32, %c0_i32_0 : i32, i32
  }
  func.func @transform_4(%arg0: i32) -> (i32, i32) {
    %c0_i32 = arith.constant 0 : i32
    %c0_i32_0 = arith.constant 0 : i32
    %c0_i32_1 = arith.constant 0 : i32
    return %c0_i32, %c0_i32_0 : i32, i32
  }
  func.func @transform_5(%arg0: i32) -> (i32, i32) {
    %c0_i32 = arith.constant 0 : i32
    %c0_i32_0 = arith.constant 0 : i32
    %c0_i32_1 = arith.constant 0 : i32
    return %c0_i32, %c0_i32_0 : i32, i32
  }
  func.func @transform_6(%arg0: i32) -> (i32, i32) {
    %c0_i32 = arith.constant 0 : i32
    %c0_i32_0 = arith.constant 0 : i32
    %c0_i32_1 = arith.constant 0 : i32
    return %c0_i32, %c0_i32_0 : i32, i32
  }
  func.func @transform_7(%arg0: i32) -> (i32, i32) {
    %c0_i32 = arith.constant 0 : i32
    %c0_i32_0 = arith.constant 0 : i32
    return %c0_i32, %arg0 : i32, i32
  }
}

</mosaic_0001>

<bundles_post_ra>
// kernel: ffnn_forward.1
= control target key start
LH: loop header
LB: loop body
LE: loop exit
PB: predicated region body
PF: predicated region fallthrough
CT: control target
= control target key end

     0   :  { %vm70_vm0 = vcmask 130048   ;;  %v760_v2 = vmov 0   ;;  %vm300_vm1 = vcmask 261120   ;;  %vm762_vm6 = vmmov 0   ;;  %s1015_s0 = inlined_call_operand.vmem [shape: f32[8,16], index: 0, kind: input, shape index: {}]   ;;  %s1016_s1 = inlined_call_operand.vmem [shape: f32[32,16], index: 1, kind: input, shape index: {}]   ;;  %s1017_s2 = inlined_call_operand.vmem [shape: f32[32,1], index: 2, kind: input, shape index: {}]   ;;  %s1018_s4 = inlined_call_operand.vmem [shape: f32[64,1], index: 4, kind: input, shape index: {}]   ;;  %s1019_s6 = inlined_call_operand.vmem [shape: f32[4,1], index: 6, kind: input, shape index: {}]   ;;  %s1020_s3 = inlined_call_operand.vmem [shape: f32[64,32], index: 3, kind: input, shape index: {}]   ;;  %s1021_s5 = inlined_call_operand.vmem [shape: f32[4,64], index: 5, kind: input, shape index: {}]   ;;  %s1022_s7 = inlined_call_operand.vmem [shape: f32[4,128], index: 7, kind: output, shape index: {}]  }
   0x1   :  { %v41_v0 = vld [vmem:[%s1015_s0 + $0x78] sm:$0xff]  ;;  %v40_v1 = vld [vmem:[%s1015_s0 + $0x70] sm:$0xff]  ;;  %734 = vset.pattern.permute.xlu0 %v760_v2  ;;  %735 = vset.pattern.permute.xlu1 %v760_v2  ;;  %v39_v3 = vld [vmem:[%s1015_s0 + $0x68] sm:$0xff]  ;;  %vm493_vm15 = vcmask 523264  }
   0x2   :  { %654 = vmatprep.subr.msk.mxu0 %vm70_vm0, %v41_v0  ;;  %v42_v4 = vld [vmem:[%s1016_s1] sm:$0xff]  ;;  %v49_v5 = vld [vmem:[%s1017_s2 + $0x18] sm:$0xff]  ;;  %v47_v6 = vld [vmem:[%s1017_s2 + $0x8] sm:$0xff] }
   0x3   :  { %655 = vmatpush3.xpose.msk.msra.mxu0 %vm70_vm0, %v41_v0  ;;  %686 = vmatprep.mubr.msk.f32.mxu0 %vm70_vm0, %v42_v4  ;;  %v38_v7 = vld [vmem:[%s1015_s0 + $0x60] sm:$0xff]  ;;  %v48_v8 = vld [vmem:[%s1017_s2 + $0x10] sm:$0xff]  ;;  %v37_v10 = vld [vmem:[%s1015_s0 + $0x58] sm:$0xff] }
   0x4   :  { %656 = vmatprep.subr.msk.mxu0 %vm70_vm0, %v40_v1  ;;  %67 = vperm.xlu0 %734, %v49_v5   ;;  %v46_v9 = vld [vmem:[%s1017_s2] sm:$0xff]  ;;  %v259_v11 = vld [vmem:[%s1018_s4 + $0x38] sm:$0xff]  ;;  %v258_v12 = vld [vmem:[%s1018_s4 + $0x30] sm:$0xff] }
   0x5   :  { %57 = vperm.xlu1 %735, %v47_v6   ;;  %v36_v13 = vld [vmem:[%s1015_s0 + $0x50] sm:$0xff]  ;;  %v257_v14 = vld [vmem:[%s1018_s4 + $0x28] sm:$0xff]  ;;  %v256_v15 = vld [vmem:[%s1018_s4 + $0x20] sm:$0xff] }
   0x6   :  { %v35_v16 = vld [vmem:[%s1015_s0 + $0x48] sm:$0xff]  ;;  %v255_v17 = vld [vmem:[%s1018_s4 + $0x18] sm:$0xff]  ;;  %v254_v18 = vld [vmem:[%s1018_s4 + $0x10] sm:$0xff] }
   0x7   :  { %657 = vmatpush3.xpose.msk.msra.mxu0 %vm70_vm0, %v40_v1  ;;  %v34_v19 = vld [vmem:[%s1015_s0 + $0x40] sm:$0xff]  ;;  %v253_v20 = vld [vmem:[%s1018_s4 + $0x8] sm:$0xff]  ;;  %v33_v22 = vld [vmem:[%s1015_s0 + $0x38] sm:$0xff] }
   0x8   :  { %658 = vmatprep.subr.msk.mxu0 %vm70_vm0, %v39_v3  ;;  %62 = vperm.xlu0 %734, %v48_v8   ;;  %v252_v21 = vld [vmem:[%s1018_s4] sm:$0xff]  ;;  %v32_v24 = vld [vmem:[%s1015_s0 + $0x30] sm:$0xff]  ;;  %v31_v25 = vld [vmem:[%s1015_s0 + $0x28] sm:$0xff] }
   0x9   :  { %52 = vperm.xlu1 %735, %v46_v9   ;;  %v487_v23 = vld [vmem:[%s1019_s6] sm:$0xf]  ;;  %v29_v27 = vld [vmem:[%s1015_s0 + $0x18] sm:$0xff]  ;;  %v28_v28 = vld [vmem:[%s1015_s0 + $0x10] sm:$0xff] }
   0xa   :  { %v30_v26 = vld [vmem:[%s1015_s0 + $0x20] sm:$0xff]  ;;  %v27_v29 = vld [vmem:[%s1015_s0 + $0x8] sm:$0xff]  ;;  %v44_v32 = vld [vmem:[%s1016_s1 + $0x10] sm:$0xff] }
   0xb   :  { %659 = vmatpush3.xpose.msk.msra.mxu0 %vm70_vm0, %v39_v3  ;;  %v26_v30 = vld [vmem:[%s1015_s0] sm:$0xff]  ;;  %v43_v31 = vld [vmem:[%s1016_s1 + $0x8] sm:$0xff]  ;;  %v45_v33 = vld [vmem:[%s1016_s1 + $0x18] sm:$0xff] }
   0xc   :  { %660 = vmatprep.subr.msk.mxu0 %vm70_vm0, %v38_v7  ;;  %297 = vperm.xlu0 %734, %v259_v11   ;;  %v244_v34 = vld [vmem:[%s1020_s3] sm:$0xff]  ;;  %v246_v8 = vld [vmem:[%s1020_s3 + $0x10] sm:$0xff]  ;;  %v247_v9 = vld [vmem:[%s1020_s3 + $0x18] sm:$0xff] }
   0xd   :  { %292 = vperm.xlu1 %735, %v258_v12   ;;  %700 = vmatprep.mubr.msk.f32.mxu1 %vm300_vm1, %v244_v34  ;;  %v249_v11 = vld [vmem:[%s1020_s3 + $0x28] sm:$0xff]  ;;  %v250_v12 = vld [vmem:[%s1020_s3 + $0x30] sm:$0xff] }
   0xf   :  { %661 = vmatpush3.xpose.msk.msra.mxu0 %vm70_vm0, %v38_v7  ;;  %v245_v7 = vld [vmem:[%s1020_s3 + $0x8] sm:$0xff] }
  0x10   :  { %662 = vmatprep.subr.msk.mxu0 %vm70_vm0, %v37_v10  ;;  %287 = vperm.xlu0 %734, %v257_v14   ;;  %v761_v14 = vmov 0.0  }
  0x11   :  { %282 = vperm.xlu1 %735, %v256_v15  }
  0x13   :  { %663 = vmatpush3.xpose.msk.msra.mxu0 %vm70_vm0, %v37_v10  ;;  %v248_v10 = vld [vmem:[%s1020_s3 + $0x20] sm:$0xff] }
  0x14   :  { %664 = vmatprep.subr.msk.mxu0 %vm70_vm0, %v36_v13  ;;  %277 = vperm.xlu0 %734, %v255_v17  }
  0x15   :  { %272 = vperm.xlu1 %735, %v254_v18  }
  0x17   :  { %665 = vmatpush3.xpose.msk.msra.mxu0 %vm70_vm0, %v36_v13  ;;  %v251_v13 = vld [vmem:[%s1020_s3 + $0x38] sm:$0xff] }
  0x18   :  { %666 = vmatprep.subr.msk.mxu0 %vm70_vm0, %v35_v16  ;;  %267 = vperm.xlu0 %734, %v253_v20  }
  0x19   :  { %262 = vperm.xlu1 %735, %v252_v21  }
  0x1b   :  { %667 = vmatpush3.xpose.msk.msra.mxu0 %vm70_vm0, %v35_v16 }
  0x1c   :  { %668 = vmatprep.subr.msk.mxu0 %vm70_vm0, %v34_v19  ;;  %490 = vperm.xlu0 %734, %v487_v23  }
  0x1f   :  { %669 = vmatpush3.xpose.msk.msra.mxu0 %vm70_vm0, %v34_v19 }
  0x20   :  { %670 = vmatprep.subr.msk.mxu0 %vm70_vm0, %v33_v22 }
  0x23   :  { %671 = vmatpush3.xpose.msk.msra.mxu0 %vm70_vm0, %v33_v22 }
  0x24   :  { %672 = vmatprep.subr.msk.mxu0 %vm70_vm0, %v32_v24 }
  0x27   :  { %673 = vmatpush3.xpose.msk.msra.mxu0 %vm70_vm0, %v32_v24 }
  0x28   :  { %674 = vmatprep.subr.msk.mxu0 %vm70_vm0, %v31_v25 }
  0x2b   :  { %675 = vmatpush3.xpose.msk.msra.mxu0 %vm70_vm0, %v31_v25 }
  0x2c   :  { %676 = vmatprep.subr.msk.mxu0 %vm70_vm0, %v30_v26 }
  0x2f   :  { %677 = vmatpush3.xpose.msk.msra.mxu0 %vm70_vm0, %v30_v26 }
  0x30   :  { %678 = vmatprep.subr.msk.mxu0 %vm70_vm0, %v29_v27 }
  0x33   :  { %679 = vmatpush3.xpose.msk.msra.mxu0 %vm70_vm0, %v29_v27 }
  0x34   :  { %680 = vmatprep.subr.msk.mxu0 %vm70_vm0, %v28_v28 }
  0x37   :  { %681 = vmatpush3.xpose.msk.msra.mxu0 %vm70_vm0, %v28_v28 }
  0x38   :  { %682 = vmatprep.subr.msk.mxu0 %vm70_vm0, %v27_v29 }
  0x3b   :  { %683 = vmatpush3.xpose.msk.msra.mxu0 %vm70_vm0, %v27_v29 }
  0x3c   :  { %684 = vmatprep.subr.msk.mxu0 %vm70_vm0, %v26_v30 }
  0x3f   :  { %685 = vmatpush3.xpose.msk.msra.mxu0 %vm70_vm0, %v26_v30 }
  0x42   :  { %687 = vmatmul.mubr.msk.f32.vlgmr.msra.gmra.mxu0 %vm70_vm0, %v43_v31 }
  0x43   :  { %689 = vmatprep.mubr.msk.f32.mxu0 %vm70_vm0, %v44_v32 }
  0x46   :  { %690 = vmatmul.mubr.msk.f32.gmra.mxu0 %vm70_vm0, %v45_v33 }
  0x7f   :  { %v68_v36 = vpop.permute.xlu0 %67 }
  0x80   :  { %v58_v35 = vpop.permute.xlu1 %57 }
  0x83   :  { %v63_v47 = vpop.permute.xlu0 %62 }
  0x84   :  { %v53_v39 = vpop.permute.xlu1 %52 }
  0x87   :  { %v298_v15 = vpop.permute.xlu0 %297 }
  0x88   :  { %v293_v16 = vpop.permute.xlu1 %292 }
  0x8b   :  { %v288_v18 = vpop.permute.xlu0 %287 }
  0x8c   :  { %v283_v20 = vpop.permute.xlu1 %282 }
  0x8f   :  { %v278_v23 = vpop.permute.xlu0 %277 }
  0x90   :  { %v273_v25 = vpop.permute.xlu1 %272 }
  0x93   :  { %v268_v33 = vpop.permute.xlu0 %267 }
 0x102   :  { %v688_v37 = vpop.f32.mrf.mxu0 }
 0x103   :  { %v203_v38 = vadd.f32 %v688_v37, %v58_v35 }
 0x104   :  { %v197_v40 = vpop.f32.mrf.mxu0 }
 0x105   :  { %v217_v41 = vmin.f32 %v203_v38, 0.0  ;;  %v198_v42 = vadd.f32 %v197_v40, %v53_v39  ;;  %vm229_vm4 = vcmp.ge.f32.partialorder %v203_v38, 0.0  ;;  %v263_v40 = vpop.permute.xlu1 %262 }
 0x106   :  { %v691_v43 = vpop.f32.mrf.mxu0 }
 0x107   :  { %v222_v44 = vmul.f32 1.442695, %v217_v41  ;;  %v216_v45 = vmin.f32 %v198_v42, 0.0  ;;  %v213_v46 = vadd.f32 %v691_v43, %v68_v36  ;;  %vm228_vm5 = vcmp.ge.f32.partialorder %v198_v42, 0.0 }
 0x108   :  { %v207_v48 = vpop.f32.mrf.mxu0 }
 0x109   :  { %v220_v49 = vmul.f32 1.442695, %v216_v45  ;;  %v219_v50 = vmin.f32 %v213_v46, 0.0  ;;  %v208_v51 = vadd.f32 %v207_v48, %v63_v47  ;;  %736 = vpow2.f32 %v222_v44 }
 0x10a   :  { %vm231_vm2 = vcmp.ge.f32.partialorder %v213_v46, 0.0 }
 0x10b   :  { %v226_v52 = vmul.f32 1.442695, %v219_v50  ;;  %v218_v53 = vmin.f32 %v208_v51, 0.0  ;;  %738 = vpow2.f32 %v220_v49  ;;  %vm230_vm3 = vcmp.ge.f32.partialorder %v208_v51, 0.0 }
 0x10d   :  { %740 = vpow2.f32 %v226_v52  ;;  %v224_v54 = vmul.f32 1.442695, %v218_v53 }
 0x10f   :  { %742 = vpow2.f32 %v224_v54 }
 0x116   :  { %v737_v55 = vpop.eup %736 }
 0x117   :  { %v593_v59 = vadd.f32 -1.0, %v737_v55 }
 0x118   :  { %v739_v56 = vpop.eup %738 }
 0x119   :  { %v592_v63 = vadd.f32 -1.0, %v739_v56  ;;  %v237_v2 = vmul.f32 0.15, %v593_v59 }
 0x11a   :  { %v741_v57 = vpop.eup %740 }
 0x11b   :  { %v595_v58 = vadd.f32 -1.0, %v741_v57  ;;  %v236_v4 = vmul.f32 0.15, %v592_v63  ;;  %v241_v5 = vsel %vm229_vm4, %v203_v38, %v237_v2 }
 0x11c   :  { %v743_v60 = vpop.eup %742 }
 0x11d   :  { %v239_v61 = vmul.f32 0.15, %v595_v58  ;;  %v594_v62 = vadd.f32 -1.0, %v743_v60  ;;  %v240_v6 = vsel %vm228_vm5, %v198_v42, %v236_v4 }
 0x11f   :  { %v243_v0 = vsel %vm231_vm2, %v213_v46, %v239_v61  ;;  %v238_v1 = vmul.f32 0.15, %v594_v62 }
 0x120   :  { %692 = vmatprep.subr.mxu1 %v243_v0 }
 0x121   :  { %693 = vmatpush3.msra.mxu1 %v243_v0  ;;  %v242_v3 = vsel %vm230_vm3, %v208_v51, %v238_v1 }
 0x122   :  { %694 = vmatprep.subr.mxu1 %v242_v3 }
 0x123   :  { %695 = vmatpush3.msra.mxu1 %v242_v3 }
 0x124   :  { %696 = vmatprep.subr.mxu1 %v241_v5 }
 0x125   :  { %697 = vmatpush3.msra.mxu1 %v241_v5 }
 0x126   :  { %698 = vmatprep.subr.mxu1 %v240_v6 }
 0x127   :  { %699 = vmatpush3.msra.mxu1 %v240_v6 }
 0x128   :  { %701 = vmatmul.mubr.msk.f32.vlgmr.msra.gmra.mxu1 %vm300_vm1, %v245_v7  ;;  %712 = vmatprep.subr.mxu1 %v761_v14 }
 0x129   :  { %703 = vmatprep.mubr.msk.f32.mxu1 %vm300_vm1, %v246_v8 }
 0x12c   :  { %704 = vmatmul.mubr.msk.f32.gmra.mxu1 %vm300_vm1, %v247_v9 }
 0x12d   :  { %706 = vmatprep.mubr.msk.f32.mxu1 %vm300_vm1, %v248_v10 }
 0x130   :  { %707 = vmatmul.mubr.msk.f32.gmra.mxu1 %vm300_vm1, %v249_v11 }
 0x131   :  { %709 = vmatprep.mubr.msk.f32.mxu1 %vm300_vm1, %v250_v12 }
 0x134   :  { %710 = vmatmul.mubr.msk.f32.gmra.mxu1 %vm300_vm1, %v251_v13 }
 0x135   :  { %728 = vmatprep.mubr.msk.f32.mxu1 %vm762_vm6, %v761_v14 }
 0x1e8   :  { %v702_v17 = vpop.f32.mrf.mxu1 }
 0x1e9   :  { %v983_v37 = vadd.f32 %v702_v17, %v268_v33 }
 0x1ea   :  { %v391_v19 = vpop.f32.mrf.mxu1 }
 0x1eb   :  { %v985_v42 = vadd.f32 %v391_v19, %v263_v40  ;;  %v431_v48 = vmin.f32 %v983_v37, 0.0  ;;  %vm455_vm13 = vcmp.ge.f32.partialorder %v983_v37, 0.0 }
 0x1ec   :  { %v705_v21 = vpop.f32.mrf.mxu1 }
 0x1ed   :  { %v972_v26 = vadd.f32 %v705_v21, %v278_v23  ;;  %v430_v50 = vmin.f32 %v985_v42, 0.0  ;;  %v440_v53 = vmul.f32 1.442695, %v431_v48  ;;  %vm454_vm14 = vcmp.ge.f32.partialorder %v985_v42, 0.0  ;;  %v486_v23 = vld [vmem:[%s1021_s5] sm:$0xf] }
 0x1ee   :  { %v401_v22 = vpop.f32.mrf.mxu1 }
 0x1ef   :  { %v979_v31 = vadd.f32 %v401_v22, %v273_v25  ;;  %v433_v34 = vmin.f32 %v972_v26, 0.0  ;;  %v438_v54 = vmul.f32 1.442695, %v430_v50  ;;  %vm457_vm11 = vcmp.ge.f32.partialorder %v972_v26, 0.0  ;;  %v491_v25 = vpop.permute.xlu0 %490 }
 0x1f0   :  { %v708_v24 = vpop.f32.mrf.mxu1 }
 0x1f1   :  { %v974_v27 = vadd.f32 %v708_v24, %v288_v18  ;;  %v432_v43 = vmin.f32 %v979_v31, 0.0  ;;  %v444_v46 = vmul.f32 1.442695, %v433_v34  ;;  %vm456_vm12 = vcmp.ge.f32.partialorder %v979_v31, 0.0 }
 0x1f2   :  { %v411_v28 = vpop.f32.mrf.mxu1 }
 0x1f3   :  { %v435_v29 = vmin.f32 %v974_v27, 0.0  ;;  %v977_v30 = vadd.f32 %v411_v28, %v283_v20  ;;  %v442_v51 = vmul.f32 1.442695, %v432_v43  ;;  %vm459_vm9 = vcmp.ge.f32.partialorder %v974_v27, 0.0 }
 0x1f4   :  { %v711_v32 = vpop.f32.mrf.mxu1 }
 0x1f5   :  { %v434_v35 = vmin.f32 %v977_v30, 0.0  ;;  %v427_v36 = vadd.f32 %v711_v32, %v298_v15  ;;  %v448_v38 = vmul.f32 1.442695, %v435_v29  ;;  %vm458_vm10 = vcmp.ge.f32.partialorder %v977_v30, 0.0 }
 0x1f6   :  { %v421_v39 = vpop.f32.mrf.mxu1 }
 0x1f7   :  { %v437_v41 = vmin.f32 %v427_v36, 0.0  ;;  %v446_v44 = vmul.f32 1.442695, %v434_v35  ;;  %v422_v45 = vadd.f32 %v421_v39, %v293_v16  ;;  %744 = vpow2.f32 %v448_v38 }
 0x1f8   :  { %vm461_vm7 = vcmp.ge.f32.partialorder %v427_v36, 0.0 }
 0x1f9   :  { %v452_v47 = vmul.f32 1.442695, %v437_v41  ;;  %v436_v49 = vmin.f32 %v422_v45, 0.0  ;;  %vm460_vm8 = vcmp.ge.f32.partialorder %v422_v45, 0.0 }
 0x1fb   :  { %746 = vpow2.f32 %v452_v47  ;;  %v450_v52 = vmul.f32 1.442695, %v436_v49 }
 0x1fc   :  { %748 = vpow2.f32 %v446_v44 }
 0x1fd   :  { %750 = vpow2.f32 %v444_v46 }
 0x1fe   :  { %752 = vpow2.f32 %v450_v52 }
 0x1ff   :  { %754 = vpow2.f32 %v442_v51 }
 0x200   :  { %756 = vpow2.f32 %v440_v53 }
 0x201   :  { %758 = vpow2.f32 %v438_v54 }
 0x204   :  { %v745_v55 = vpop.eup %744 }
 0x205   :  { %v609_v60 = vadd.f32 -1.0, %v745_v55 }
 0x207   :  { %v475_v4 = vmul.f32 0.1, %v609_v60 }
 0x208   :  { %v747_v56 = vpop.eup %746 }
 0x209   :  { %v749_v57 = vpop.eup %748  ;;  %v611_v58 = vadd.f32 -1.0, %v747_v56  ;;  %v483_v11 = vsel %vm459_vm9, %v974_v27, %v475_v4 }
 0x20a   :  { %v751_v59 = vpop.eup %750  ;;  %v608_v0 = vadd.f32 -1.0, %v749_v57 }
 0x20b   :  { %v753_v61 = vpop.eup %752  ;;  %v477_v62 = vmul.f32 0.1, %v611_v58  ;;  %v607_v5 = vadd.f32 -1.0, %v751_v59 }
 0x20c   :  { %v610_v63 = vadd.f32 -1.0, %v753_v61  ;;  %v755_v1 = vpop.eup %754  ;;  %v474_v8 = vmul.f32 0.1, %v608_v0 }
 0x20d   :  { %v485_v2 = vsel %vm461_vm7, %v427_v36, %v477_v62  ;;  %v757_v6 = vpop.eup %756  ;;  %v606_v9 = vadd.f32 -1.0, %v755_v1  ;;  %v473_v12 = vmul.f32 0.1, %v607_v5 }
 0x20e   :  { %713 = vmatpush3.msra.mxu1 %v485_v2  ;;  %v476_v3 = vmul.f32 0.1, %v610_v63  ;;  %v759_v10 = vpop.eup %758  ;;  %v605_v13 = vadd.f32 -1.0, %v757_v6  ;;  %v482_v15 = vsel %vm458_vm10, %v977_v30, %v474_v8 }
 0x20f   :  { %714 = vmatprep.subr.mxu1 %v761_v14  ;;  %v472_v16 = vmul.f32 0.1, %v606_v9  ;;  %v604_v17 = vadd.f32 -1.0, %v759_v10  ;;  %v481_v18 = vsel %vm457_vm11, %v972_v26, %v473_v12 }
 0x210   :  { %v484_v7 = vsel %vm460_vm8, %v422_v45, %v476_v3  ;;  %v471_v19 = vmul.f32 0.1, %v605_v13 }
 0x211   :  { %715 = vmatpush3.msra.mxu1 %v484_v7  ;;  %v480_v20 = vsel %vm456_vm12, %v979_v31, %v472_v16  ;;  %v470_v21 = vmul.f32 0.1, %v604_v17 }
 0x212   :  { %716 = vmatprep.subr.mxu1 %v761_v14  ;;  %v479_v22 = vsel %vm455_vm13, %v983_v37, %v471_v19 }
 0x213   :  { %717 = vmatpush3.msra.mxu1 %v483_v11  ;;  %v478_v24 = vsel %vm454_vm14, %v985_v42, %v470_v21 }
 0x214   :  { %718 = vmatprep.subr.mxu1 %v761_v14 }
 0x215   :  { %719 = vmatpush3.msra.mxu1 %v482_v15 }
 0x216   :  { %720 = vmatprep.subr.mxu1 %v761_v14 }
 0x217   :  { %721 = vmatpush3.msra.mxu1 %v481_v18 }
 0x218   :  { %722 = vmatprep.subr.mxu1 %v761_v14 }
 0x219   :  { %723 = vmatpush3.msra.mxu1 %v480_v20 }
 0x21a   :  { %724 = vmatprep.subr.mxu1 %v761_v14 }
 0x21b   :  { %725 = vmatpush3.msra.mxu1 %v479_v22 }
 0x21c   :  { %726 = vmatprep.subr.mxu1 %v761_v14 }
 0x21d   :  { %727 = vmatpush3.msra.mxu1 %v478_v24 }
 0x21e   :  { %729 = vmatmul.mubr.msk.f32.vlgmr.msra.gmra.mxu1 %vm493_vm15, %v486_v23 }
 0x2de   :  { %v563_v26 = vpop.f32.mrf.mxu1 }
 0x2df   :  { %v564_v27 = vadd.f32 %v563_v26, %v491_v25 }
 0x2e0   :  { %v730_v28 = vpop.f32.mrf.mxu1 }
 0x2e1   :  { %567 = vst [vmem:[%s1022_s7] sm:$0xf] %v564_v27 }

</bundles_post_ra>
